<compile_context>
chip_gen: v7x
topology: tpu7x:2x2x1
jax: 0.10.0
libtpu: 0.0.40
codegen_flags: <defaults>
</compile_context>

<pallas_src>
import functools

import jax
import jax.numpy as jnp
import numpy as np
from jax.experimental import pallas as pl
from jax.experimental.pallas import tpu as pltpu


def _layernorm(x, gamma, beta, eps=1e-5):
    mu = jnp.mean(x, axis=-1, keepdims=True)
    var = jnp.mean((x - mu) ** 2, axis=-1, keepdims=True)
    return (x - mu) * jax.lax.rsqrt(var + eps) * gamma + beta


def encoder_layer_kernel(
    x_ref,                         # (Bblk*S, D)
    wq_ref, bq_ref,                # (G, D, hd_qk), (G, 1, hd_qk)  [scale folded in]
    wk_ref, bk_ref,                # (G, D, hd_qk), (G, 1, hd_qk)
    wv_ref, bv_ref,                # (G, D, hd_v),  (G, 1, hd_v)
    w1_ref, b1_ref,                # (D, F), (1, F)
    w2_ref, b2_ref,                # (F, D), (1, D)
    g1_ref, be1_ref, g2_ref, be2_ref,   # (1, D) each
    o_ref,                         # (Bblk, S*D)  lane-dense output slab
    *, batch_blk, seq, num_heads,
):
    x = x_ref[...]                                   # (N, D) f32, N = Bblk*S
    n_rows, dim = x.shape
    x3 = x.reshape(batch_blk, seq, dim)              # (Bblk, S, D) (sublane-tile split)
    # Combined (head, batch) axis g = h*Bblk + b; duplicating x over heads is a cheap
    # major-dim concat (no lane slicing anywhere in the kernel).
    xg = jnp.concatenate([x3] * num_heads, axis=0)   # (G, S, D)

    # ---- MultiHeadAttention (q = k = v = x), mask=None, dropout=0.0 ---------
    # TODO(synk): attention-mask path (mask is None in this config) not implemented.
    q = jnp.einsum('gsd,gde->gse', xg, wq_ref[...],
                   preferred_element_type=jnp.float32) + bq_ref[...]
    k = jnp.einsum('gsd,gde->gse', xg, wk_ref[...],
                   preferred_element_type=jnp.float32) + bk_ref[...]
    v = jnp.einsum('gsd,gde->gse', xg, wv_ref[...],
                   preferred_element_type=jnp.float32) + bv_ref[...]

    # Scores: contraction over the last dims -> no materialized K transpose.
    scores = jnp.einsum('gqe,gke->gqk', q, k,
                        preferred_element_type=jnp.float32)          # (G, S, S)
    scores = scores - jnp.max(scores, axis=-1, keepdims=True)
    p = jnp.exp(scores)
    p = p * pl.reciprocal(jnp.sum(p, axis=-1, keepdims=True), approx=True)
    og = jnp.einsum('gqk,gke->gqe', p, v,
                    preferred_element_type=jnp.float32)              # (G, S, hd_v)

    # Recombine heads onto the lane axis (single concat over H pieces, done once
    # for the whole row-block rather than per batch element).
    hd_v = og.shape[-1]
    attn = jnp.concatenate(
        [og[h * batch_blk:(h + 1) * batch_blk].reshape(n_rows, hd_v)
         for h in range(num_heads)],
        axis=-1)                                                     # (N, dim_v)

    # ---- residual + LayerNorm 1 ---------------------------------------------
    x1 = _layernorm(attn + x, g1_ref[...], be1_ref[...])

    # ---- Feedforward (fc1 -> ReLU -> fc2) + residual + LayerNorm 2 ----------
    h1 = jnp.dot(x1, w1_ref[...], preferred_element_type=jnp.float32) + b1_ref[...]
    h1 = jnp.maximum(h1, 0.0)
    h2 = jnp.dot(h1, w2_ref[...], preferred_element_type=jnp.float32) + b2_ref[...]
    y = _layernorm(h2 + x1, g2_ref[...], be2_ref[...])               # (N, D)

    # ---- lane-dense output: pack (N, D) rows into (Bblk, S*D) ---------------
    y3 = y.reshape(batch_blk, seq, dim)
    o_ref[...] = jnp.concatenate([y3[:, s_, :] for s_ in range(seq)], axis=-1)


def encoder_layer(x, params, *, num_heads):
    B, S, D = x.shape
    (wq, bq, wk, bk, wv, bv, w1, b1, w2, b2, g1, be1, g2, be2) = params
    dim_qk = wq.shape[1]
    dim_v = wv.shape[1]
    H = num_heads
    assert dim_v == D, "residual add requires dim_v == dim (module default)"
    assert dim_qk % H == 0 and dim_v % H == 0

    # Row-block over batch: one grid step handles as many sequences as fit a decent
    # row count; with B=2, S=8 this is a single step covering all 16 rows. For larger
    # B the 'parallel' grid axis shards row-blocks across TensorCores (v7x megacore).
    rows_target = 256
    b_blk = max(1, min(B, rows_target // S)) if S <= rows_target else 1
    while B % b_blk:
        b_blk -= 1
    n_blk = b_blk * S
    grid = (B // b_blk,)
    hd_qk = dim_qk // H
    hd_v = dim_v // H

    # Pre-split projection weights per (head, batch-in-block) slot in plain JAX
    # (free), so the kernel does only canonical batched matmuls. Fold the
    # 1/sqrt(dim_qk) softmax scale into Wq and bq.
    scale = 1.0 / (float(dim_qk) ** 0.5)

    def per_head(w, b, hd, sc):
        wh = (w * sc).reshape(D, H, hd).transpose(1, 0, 2)   # (H, D, hd)
        bh = (b * sc).reshape(1, H, hd).transpose(1, 0, 2)   # (H, 1, hd)
        return jnp.repeat(wh, b_blk, axis=0), jnp.repeat(bh, b_blk, axis=0)

    wq_g, bq_g = per_head(wq, bq, hd_qk, scale)
    wk_g, bk_g = per_head(wk, bk, hd_qk, 1.0)
    wv_g, bv_g = per_head(wv, bv, hd_v, 1.0)

    x2d = x.reshape(B * S, D)

    def full(a):
        nd = a.ndim
        return pl.BlockSpec(a.shape, lambda i, _nd=nd: (0,) * _nd)

    kernel = functools.partial(
        encoder_layer_kernel, batch_blk=b_blk, seq=S, num_heads=H)

    out = pl.pallas_call(
        kernel,
        out_shape=jax.ShapeDtypeStruct((B, S * D), jnp.float32),
        grid_spec=pltpu.PrefetchScalarGridSpec(
            num_scalar_prefetch=0,
            grid=grid,
            in_specs=[
                pl.BlockSpec((n_blk, D), lambda i: (i, 0)),   # x rows (row-block)
                full(wq_g), full(bq_g),
                full(wk_g), full(bk_g),
                full(wv_g), full(bv_g),
                full(w1), full(b1),
                full(w2), full(b2),
                full(g1), full(be1), full(g2), full(be2),
            ],
            out_specs=pl.BlockSpec((b_blk, S * D), lambda i: (i, 0)),
        ),
        compiler_params=pltpu.CompilerParams(
            dimension_semantics=("parallel",)),
    )(x2d, wq_g, bq_g, wk_g, bk_g, wv_g, bv_g,
      w1, b1, w2, b2, g1, be1, g2, be2)

    return out.reshape(B, S, D)


def reference(x, params, *, num_heads):
    (wq, bq, wk, bk, wv, bv, w1, b1, w2, b2, g1, be1, g2, be2) = params
    B, S, D = x.shape
    dim_qk, dim_v = wq.shape[1], wv.shape[1]
    hd_qk, hd_v = dim_qk // num_heads, dim_v // num_heads

    def ln(y, g, b):
        mu = jnp.mean(y, -1, keepdims=True)
        var = jnp.mean((y - mu) ** 2, -1, keepdims=True)
        return (y - mu) / jnp.sqrt(var + 1e-5) * g + b

    q = (x @ wq + bq).reshape(B, S, num_heads, hd_qk).transpose(0, 2, 1, 3)
    k = (x @ wk + bk).reshape(B, S, num_heads, hd_qk).transpose(0, 2, 1, 3)
    v = (x @ wv + bv).reshape(B, S, num_heads, hd_v).transpose(0, 2, 1, 3)
    attn = jax.nn.softmax(q @ jnp.swapaxes(k, -2, -1) / (dim_qk ** 0.5), axis=-1)
    out = (attn @ v).transpose(0, 2, 1, 3).reshape(B, S, dim_v)
    y = ln(out + x, g1, be1)
    ff = jnp.maximum(y @ w1 + b1, 0.0) @ w2 + b2
    return ln(ff + y, g2, be2)


if __name__ == "__main__":
    B, S, D, H = 2, 8, 32, 2
    hidden = 4 * D
    key = jax.random.PRNGKey(0)
    keys = jax.random.split(key, 16)

    def lin(kw, kb, fan_in, fan_out):
        # deterministic, small-magnitude init; weight stored as (in, out)
        w = jax.random.normal(kw, (fan_in, fan_out), jnp.float32) * 0.05
        b = jax.random.normal(kb, (1, fan_out), jnp.float32) * 0.05
        return w, b

    wq, bq = lin(keys[0], keys[1], D, D)
    wk, bk = lin(keys[2], keys[3], D, D)
    wv, bv = lin(keys[4], keys[5], D, D)
    w1, b1 = lin(keys[6], keys[7], D, hidden)
    w2, b2 = lin(keys[8], keys[9], hidden, D)
    g1 = jnp.ones((1, D), jnp.float32)
    be1 = jnp.zeros((1, D), jnp.float32)
    g2 = jnp.ones((1, D), jnp.float32)
    be2 = jnp.zeros((1, D), jnp.float32)
    params = (wq, bq, wk, bk, wv, bv, w1, b1, w2, b2, g1, be1, g2, be2)

    x = jax.random.normal(keys[10], (B, S, D), jnp.float32)

    out = encoder_layer(x, params, num_heads=H)
    out = jax.block_until_ready(out)

    ref = reference(x, params, num_heads=H)
    # Tolerance accounts for the EUP approximate reciprocal in the softmax denominator.
    np.testing.assert_allclose(np.asarray(out), np.asarray(ref), rtol=5e-3, atol=5e-3)
    print("KERNEL_OK")
</pallas_src>

<mosaic_0001>
module attributes {stable_mosaic.version = 11 : i64} {
  func.func @encoder_layer_kernel(%arg0: i32, %arg1: memref<16x32xf32, #tpu.memory_space<vmem>>, %arg2: memref<4x32x16xf32, #tpu.memory_space<vmem>>, %arg3: memref<4x1x16xf32, #tpu.memory_space<vmem>>, %arg4: memref<4x32x16xf32, #tpu.memory_space<vmem>>, %arg5: memref<4x1x16xf32, #tpu.memory_space<vmem>>, %arg6: memref<4x32x16xf32, #tpu.memory_space<vmem>>, %arg7: memref<4x1x16xf32, #tpu.memory_space<vmem>>, %arg8: memref<32x128xf32, #tpu.memory_space<vmem>>, %arg9: memref<1x128xf32, #tpu.memory_space<vmem>>, %arg10: memref<128x32xf32, #tpu.memory_space<vmem>>, %arg11: memref<1x32xf32, #tpu.memory_space<vmem>>, %arg12: memref<1x32xf32, #tpu.memory_space<vmem>>, %arg13: memref<1x32xf32, #tpu.memory_space<vmem>>, %arg14: memref<1x32xf32, #tpu.memory_space<vmem>>, %arg15: memref<1x32xf32, #tpu.memory_space<vmem>>, %arg16: memref<2x256xf32, #tpu.memory_space<vmem>>) attributes {dimension_semantics = [#tpu.dimension_semantics<parallel>], iteration_bounds = array<i64: 1>, scalar_prefetch = 0 : i64, scratch_operands = 0 : i64, tpu.core_type = #tpu.core_type<tc>, window_params = [{transform_indices = @transform_0, window_bounds = array<i64: 16, 32>}, {pipeline_mode = #tpu.pipeline_mode<synchronous>, transform_indices = @transform_1, window_bounds = array<i64: 4, 32, 16>}, {pipeline_mode = #tpu.pipeline_mode<synchronous>, transform_indices = @transform_2, window_bounds = array<i64: 4, 1, 16>}, {pipeline_mode = #tpu.pipeline_mode<synchronous>, transform_indices = @transform_3, window_bounds = array<i64: 4, 32, 16>}, {pipeline_mode = #tpu.pipeline_mode<synchronous>, transform_indices = @transform_4, window_bounds = array<i64: 4, 1, 16>}, {pipeline_mode = #tpu.pipeline_mode<synchronous>, transform_indices = @transform_5, window_bounds = array<i64: 4, 32, 16>}, {pipeline_mode = #tpu.pipeline_mode<synchronous>, transform_indices = @transform_6, window_bounds = array<i64: 4, 1, 16>}, {pipeline_mode = #tpu.pipeline_mode<synchronous>, transform_indices = @transform_7, window_bounds = array<i64: 32, 128>}, {pipeline_mode = #tpu.pipeline_mode<synchronous>, transform_indices = @transform_8, window_bounds = array<i64: 1, 128>}, {pipeline_mode = #tpu.pipeline_mode<synchronous>, transform_indices = @transform_9, window_bounds = array<i64: 128, 32>}, {pipeline_mode = #tpu.pipeline_mode<synchronous>, transform_indices = @transform_10, window_bounds = array<i64: 1, 32>}, {pipeline_mode = #tpu.pipeline_mode<synchronous>, transform_indices = @transform_11, window_bounds = array<i64: 1, 32>}, {pipeline_mode = #tpu.pipeline_mode<synchronous>, transform_indices = @transform_12, window_bounds = array<i64: 1, 32>}, {pipeline_mode = #tpu.pipeline_mode<synchronous>, transform_indices = @transform_13, window_bounds = array<i64: 1, 32>}, {pipeline_mode = #tpu.pipeline_mode<synchronous>, transform_indices = @transform_14, window_bounds = array<i64: 1, 32>}, {transform_indices = @transform_15, window_bounds = array<i64: 2, 256>}]} {
    %c0 = arith.constant 0 : index
    %c0_0 = arith.constant 0 : index
    %0 = vector.load %arg1[%c0, %c0_0] : memref<16x32xf32, #tpu.memory_space<vmem>>, vector<16x32xf32>
    %1 = vector.shape_cast %0 : vector<16x32xf32> to vector<2x8x32xf32>
    %2 = tpu.concatenate %1, %1 in 0 : vector<2x8x32xf32>, vector<2x8x32xf32> -> vector<4x8x32xf32>
    %c0_1 = arith.constant 0 : index
    %c0_2 = arith.constant 0 : index
    %c0_3 = arith.constant 0 : index
    %3 = vector.load %arg2[%c0_1, %c0_2, %c0_3] : memref<4x32x16xf32, #tpu.memory_space<vmem>>, vector<4x32x16xf32>
    "tpu.trace_start"() <{level = 10 : i32, message = "gsd,gde->gse"}> : () -> ()
    %cst = arith.constant dense<0.000000e+00> : vector<4x8x16xf32>
    %4 = tpu.matmul %2, %3, %cst {dimension_numbers = #tpu.dot_dimension_numbers<[2], [1], [1], [2], [0, 0, 0, 1, 1, 2], [0], [0]>} : vector<4x8x32xf32>, vector<4x32x16xf32>, vector<4x8x16xf32> -> vector<4x8x16xf32>
    "tpu.trace_stop"() : () -> ()
    %c0_4 = arith.constant 0 : index
    %c0_5 = arith.constant 0 : index
    %c0_6 = arith.constant 0 : index
    %5 = vector.load %arg3[%c0_4, %c0_5, %c0_6] : memref<4x1x16xf32, #tpu.memory_space<vmem>>, vector<4x1x16xf32>
    %6 = vector.broadcast %5 : vector<4x1x16xf32> to vector<4x8x16xf32>
    %7 = arith.addf %4, %6 : vector<4x8x16xf32>
    %c0_7 = arith.constant 0 : index
    %c0_8 = arith.constant 0 : index
    %c0_9 = arith.constant 0 : index
    %8 = vector.load %arg4[%c0_7, %c0_8, %c0_9] : memref<4x32x16xf32, #tpu.memory_space<vmem>>, vector<4x32x16xf32>
    "tpu.trace_start"() <{level = 10 : i32, message = "gsd,gde->gse"}> : () -> ()
    %cst_10 = arith.constant dense<0.000000e+00> : vector<4x8x16xf32>
    %9 = tpu.matmul %2, %8, %cst_10 {dimension_numbers = #tpu.dot_dimension_numbers<[2], [1], [1], [2], [0, 0, 0, 1, 1, 2], [0], [0]>} : vector<4x8x32xf32>, vector<4x32x16xf32>, vector<4x8x16xf32> -> vector<4x8x16xf32>
    "tpu.trace_stop"() : () -> ()
    %c0_11 = arith.constant 0 : index
    %c0_12 = arith.constant 0 : index
    %c0_13 = arith.constant 0 : index
    %10 = vector.load %arg5[%c0_11, %c0_12, %c0_13] : memref<4x1x16xf32, #tpu.memory_space<vmem>>, vector<4x1x16xf32>
    %11 = vector.broadcast %10 : vector<4x1x16xf32> to vector<4x8x16xf32>
    %12 = arith.addf %9, %11 : vector<4x8x16xf32>
    %c0_14 = arith.constant 0 : index
    %c0_15 = arith.constant 0 : index
    %c0_16 = arith.constant 0 : index
    %13 = vector.load %arg6[%c0_14, %c0_15, %c0_16] : memref<4x32x16xf32, #tpu.memory_space<vmem>>, vector<4x32x16xf32>
    "tpu.trace_start"() <{level = 10 : i32, message = "gsd,gde->gse"}> : () -> ()
    %cst_17 = arith.constant dense<0.000000e+00> : vector<4x8x16xf32>
    %14 = tpu.matmul %2, %13, %cst_17 {dimension_numbers = #tpu.dot_dimension_numbers<[2], [1], [1], [2], [0, 0, 0, 1, 1, 2], [0], [0]>} : vector<4x8x32xf32>, vector<4x32x16xf32>, vector<4x8x16xf32> -> vector<4x8x16xf32>
    "tpu.trace_stop"() : () -> ()
    %c0_18 = arith.constant 0 : index
    %c0_19 = arith.constant 0 : index
    %c0_20 = arith.constant 0 : index
    %15 = vector.load %arg7[%c0_18, %c0_19, %c0_20] : memref<4x1x16xf32, #tpu.memory_space<vmem>>, vector<4x1x16xf32>
    %16 = vector.broadcast %15 : vector<4x1x16xf32> to vector<4x8x16xf32>
    %17 = arith.addf %14, %16 : vector<4x8x16xf32>
    "tpu.trace_start"() <{level = 10 : i32, message = "gqe,gke->gqk"}> : () -> ()
    %cst_21 = arith.constant dense<0.000000e+00> : vector<4x8x8xf32>
    %18 = tpu.matmul %7, %12, %cst_21 {dimension_numbers = #tpu.dot_dimension_numbers<[2], [2], [1], [1], [0, 0, 0, 1, 1, 1], [0], [0]>} : vector<4x8x16xf32>, vector<4x8x16xf32>, vector<4x8x8xf32> -> vector<4x8x8xf32>
    "tpu.trace_stop"() : () -> ()
    %cst_22 = arith.constant dense<0xFF800000> : vector<4x8xf32>
    %19 = vector.multi_reduction <maximumf>, %18, %cst_22 [2] : vector<4x8x8xf32> to vector<4x8xf32>
    %20 = vector.shape_cast %19 : vector<4x8xf32> to vector<4x8x1xf32>
    %21 = vector.broadcast %20 : vector<4x8x1xf32> to vector<4x8x8xf32>
    %22 = arith.subf %18, %21 : vector<4x8x8xf32>
    %23 = math.exp %22 : vector<4x8x8xf32>
    %cst_23 = arith.constant dense<0.000000e+00> : vector<4x8xf32>
    %24 = vector.multi_reduction <add>, %23, %cst_23 [2] : vector<4x8x8xf32> to vector<4x8xf32>
    %25 = vector.shape_cast %24 : vector<4x8xf32> to vector<4x8x1xf32>
    %26 = tpu.reciprocal %25 {approx = true} : vector<4x8x1xf32> -> vector<4x8x1xf32>
    %27 = vector.broadcast %26 : vector<4x8x1xf32> to vector<4x8x8xf32>
    %28 = arith.mulf %23, %27 : vector<4x8x8xf32>
    "tpu.trace_start"() <{level = 10 : i32, message = "gqk,gke->gqe"}> : () -> ()
    %cst_24 = arith.constant dense<0.000000e+00> : vector<4x8x16xf32>
    %29 = tpu.matmul %28, %17, %cst_24 {dimension_numbers = #tpu.dot_dimension_numbers<[2], [1], [1], [2], [0, 0, 0, 1, 1, 2], [0], [0]>} : vector<4x8x8xf32>, vector<4x8x16xf32>, vector<4x8x16xf32> -> vector<4x8x16xf32>
    "tpu.trace_stop"() : () -> ()
    %30 = vector.extract_strided_slice %29 {offsets = [0, 0, 0], sizes = [2, 8, 16], strides = [1, 1, 1]} : vector<4x8x16xf32> to vector<2x8x16xf32>
    %31 = vector.shape_cast %30 : vector<2x8x16xf32> to vector<16x16xf32>
    %32 = vector.extract_strided_slice %29 {offsets = [2, 0, 0], sizes = [2, 8, 16], strides = [1, 1, 1]} : vector<4x8x16xf32> to vector<2x8x16xf32>
    %33 = vector.shape_cast %32 : vector<2x8x16xf32> to vector<16x16xf32>
    %34 = tpu.concatenate %31, %33 in 1 : vector<16x16xf32>, vector<16x16xf32> -> vector<16x32xf32>
    %35 = arith.addf %34, %0 : vector<16x32xf32>
    %c0_25 = arith.constant 0 : index
    %c0_26 = arith.constant 0 : index
    %36 = vector.load %arg12[%c0_25, %c0_26] : memref<1x32xf32, #tpu.memory_space<vmem>>, vector<1x32xf32>
    %c0_27 = arith.constant 0 : index
    %c0_28 = arith.constant 0 : index
    %37 = vector.load %arg13[%c0_27, %c0_28] : memref<1x32xf32, #tpu.memory_space<vmem>>, vector<1x32xf32>
    %cst_29 = arith.constant dense<0.000000e+00> : vector<16xf32>
    %38 = vector.multi_reduction <add>, %35, %cst_29 [1] : vector<16x32xf32> to vector<16xf32>
    %39 = vector.shape_cast %38 : vector<16xf32> to vector<16x1xf32>
    %cst_30 = arith.constant 3.200000e+01 : f32
    %40 = vector.broadcast %cst_30 : f32 to vector<16x1xf32>
    %41 = arith.divf %39, %40 : vector<16x1xf32>
    %42 = vector.broadcast %41 : vector<16x1xf32> to vector<16x32xf32>
    %43 = arith.subf %35, %42 : vector<16x32xf32>
    %44 = arith.mulf %43, %43 : vector<16x32xf32>
    %cst_31 = arith.constant dense<0.000000e+00> : vector<16xf32>
    %45 = vector.multi_reduction <add>, %44, %cst_31 [1] : vector<16x32xf32> to vector<16xf32>
    %46 = vector.shape_cast %45 : vector<16xf32> to vector<16x1xf32>
    %cst_32 = arith.constant 3.200000e+01 : f32
    %47 = vector.broadcast %cst_32 : f32 to vector<16x1xf32>
    %48 = arith.divf %46, %47 : vector<16x1xf32>
    %49 = vector.broadcast %41 : vector<16x1xf32> to vector<16x32xf32>
    %50 = arith.subf %35, %49 : vector<16x32xf32>
    %cst_33 = arith.constant 9.99999974E-6 : f32
    %51 = vector.broadcast %cst_33 : f32 to vector<16x1xf32>
    %52 = arith.addf %48, %51 : vector<16x1xf32>
    %53 = math.rsqrt %52 : vector<16x1xf32>
    %54 = vector.broadcast %53 : vector<16x1xf32> to vector<16x32xf32>
    %55 = arith.mulf %50, %54 : vector<16x32xf32>
    %56 = vector.broadcast %36 : vector<1x32xf32> to vector<16x32xf32>
    %57 = arith.mulf %55, %56 : vector<16x32xf32>
    %58 = vector.broadcast %37 : vector<1x32xf32> to vector<16x32xf32>
    %59 = arith.addf %57, %58 : vector<16x32xf32>
    %c0_34 = arith.constant 0 : index
    %c0_35 = arith.constant 0 : index
    %60 = vector.load %arg8[%c0_34, %c0_35] : memref<32x128xf32, #tpu.memory_space<vmem>>, vector<32x128xf32>
    %cst_36 = arith.constant dense<0.000000e+00> : vector<16x128xf32>
    %61 = tpu.matmul %59, %60, %cst_36 {dimension_numbers = #tpu.dot_dimension_numbers<[1], [0], [0], [1], [0, 0, 1, 1], [], []>} : vector<16x32xf32>, vector<32x128xf32>, vector<16x128xf32> -> vector<16x128xf32>
    %c0_37 = arith.constant 0 : index
    %c0_38 = arith.constant 0 : index
    %62 = vector.load %arg9[%c0_37, %c0_38] : memref<1x128xf32, #tpu.memory_space<vmem>>, vector<1x128xf32>
    %63 = vector.broadcast %62 : vector<1x128xf32> to vector<16x128xf32>
    %64 = arith.addf %61, %63 : vector<16x128xf32>
    %cst_39 = arith.constant 0.000000e+00 : f32
    %65 = vector.broadcast %cst_39 : f32 to vector<16x128xf32>
    %66 = arith.maximumf %64, %65 : vector<16x128xf32>
    %c0_40 = arith.constant 0 : index
    %c0_41 = arith.constant 0 : index
    %67 = vector.load %arg10[%c0_40, %c0_41] : memref<128x32xf32, #tpu.memory_space<vmem>>, vector<128x32xf32>
    %cst_42 = arith.constant dense<0.000000e+00> : vector<16x32xf32>
    %68 = tpu.matmul %66, %67, %cst_42 {dimension_numbers = #tpu.dot_dimension_numbers<[1], [0], [0], [1], [0, 0, 1, 1], [], []>} : vector<16x128xf32>, vector<128x32xf32>, vector<16x32xf32> -> vector<16x32xf32>
    %c0_43 = arith.constant 0 : index
    %c0_44 = arith.constant 0 : index
    %69 = vector.load %arg11[%c0_43, %c0_44] : memref<1x32xf32, #tpu.memory_space<vmem>>, vector<1x32xf32>
    %70 = vector.broadcast %69 : vector<1x32xf32> to vector<16x32xf32>
    %71 = arith.addf %68, %70 : vector<16x32xf32>
    %72 = arith.addf %71, %59 : vector<16x32xf32>
    %c0_45 = arith.constant 0 : index
    %c0_46 = arith.constant 0 : index
    %73 = vector.load %arg14[%c0_45, %c0_46] : memref<1x32xf32, #tpu.memory_space<vmem>>, vector<1x32xf32>
    %c0_47 = arith.constant 0 : index
    %c0_48 = arith.constant 0 : index
    %74 = vector.load %arg15[%c0_47, %c0_48] : memref<1x32xf32, #tpu.memory_space<vmem>>, vector<1x32xf32>
    %cst_49 = arith.constant dense<0.000000e+00> : vector<16xf32>
    %75 = vector.multi_reduction <add>, %72, %cst_49 [1] : vector<16x32xf32> to vector<16xf32>
    %76 = vector.shape_cast %75 : vector<16xf32> to vector<16x1xf32>
    %cst_50 = arith.constant 3.200000e+01 : f32
    %77 = vector.broadcast %cst_50 : f32 to vector<16x1xf32>
    %78 = arith.divf %76, %77 : vector<16x1xf32>
    %79 = vector.broadcast %78 : vector<16x1xf32> to vector<16x32xf32>
    %80 = arith.subf %72, %79 : vector<16x32xf32>
    %81 = arith.mulf %80, %80 : vector<16x32xf32>
    %cst_51 = arith.constant dense<0.000000e+00> : vector<16xf32>
    %82 = vector.multi_reduction <add>, %81, %cst_51 [1] : vector<16x32xf32> to vector<16xf32>
    %83 = vector.shape_cast %82 : vector<16xf32> to vector<16x1xf32>
    %cst_52 = arith.constant 3.200000e+01 : f32
    %84 = vector.broadcast %cst_52 : f32 to vector<16x1xf32>
    %85 = arith.divf %83, %84 : vector<16x1xf32>
    %86 = vector.broadcast %78 : vector<16x1xf32> to vector<16x32xf32>
    %87 = arith.subf %72, %86 : vector<16x32xf32>
    %cst_53 = arith.constant 9.99999974E-6 : f32
    %88 = vector.broadcast %cst_53 : f32 to vector<16x1xf32>
    %89 = arith.addf %85, %88 : vector<16x1xf32>
    %90 = math.rsqrt %89 : vector<16x1xf32>
    %91 = vector.broadcast %90 : vector<16x1xf32> to vector<16x32xf32>
    %92 = arith.mulf %87, %91 : vector<16x32xf32>
    %93 = vector.broadcast %73 : vector<1x32xf32> to vector<16x32xf32>
    %94 = arith.mulf %92, %93 : vector<16x32xf32>
    %95 = vector.broadcast %74 : vector<1x32xf32> to vector<16x32xf32>
    %96 = arith.addf %94, %95 : vector<16x32xf32>
    %97 = vector.shape_cast %96 : vector<16x32xf32> to vector<2x8x32xf32>
    %98 = vector.extract_strided_slice %97 {offsets = [0, 0, 0], sizes = [2, 1, 32], strides = [1, 1, 1]} : vector<2x8x32xf32> to vector<2x1x32xf32>
    %99 = vector.shape_cast %98 : vector<2x1x32xf32> to vector<2x32xf32>
    %100 = vector.extract_strided_slice %97 {offsets = [0, 1, 0], sizes = [2, 1, 32], strides = [1, 1, 1]} : vector<2x8x32xf32> to vector<2x1x32xf32>
    %101 = vector.shape_cast %100 : vector<2x1x32xf32> to vector<2x32xf32>
    %102 = vector.extract_strided_slice %97 {offsets = [0, 2, 0], sizes = [2, 1, 32], strides = [1, 1, 1]} : vector<2x8x32xf32> to vector<2x1x32xf32>
    %103 = vector.shape_cast %102 : vector<2x1x32xf32> to vector<2x32xf32>
    %104 = vector.extract_strided_slice %97 {offsets = [0, 3, 0], sizes = [2, 1, 32], strides = [1, 1, 1]} : vector<2x8x32xf32> to vector<2x1x32xf32>
    %105 = vector.shape_cast %104 : vector<2x1x32xf32> to vector<2x32xf32>
    %106 = vector.extract_strided_slice %97 {offsets = [0, 4, 0], sizes = [2, 1, 32], strides = [1, 1, 1]} : vector<2x8x32xf32> to vector<2x1x32xf32>
    %107 = vector.shape_cast %106 : vector<2x1x32xf32> to vector<2x32xf32>
    %108 = vector.extract_strided_slice %97 {offsets = [0, 5, 0], sizes = [2, 1, 32], strides = [1, 1, 1]} : vector<2x8x32xf32> to vector<2x1x32xf32>
    %109 = vector.shape_cast %108 : vector<2x1x32xf32> to vector<2x32xf32>
    %110 = vector.extract_strided_slice %97 {offsets = [0, 6, 0], sizes = [2, 1, 32], strides = [1, 1, 1]} : vector<2x8x32xf32> to vector<2x1x32xf32>
    %111 = vector.shape_cast %110 : vector<2x1x32xf32> to vector<2x32xf32>
    %112 = vector.extract_strided_slice %97 {offsets = [0, 7, 0], sizes = [2, 1, 32], strides = [1, 1, 1]} : vector<2x8x32xf32> to vector<2x1x32xf32>
    %113 = vector.shape_cast %112 : vector<2x1x32xf32> to vector<2x32xf32>
    %114 = tpu.concatenate %99, %101, %103, %105, %107, %109, %111, %113 in 1 : vector<2x32xf32>, vector<2x32xf32>, vector<2x32xf32>, vector<2x32xf32>, vector<2x32xf32>, vector<2x32xf32>, vector<2x32xf32>, vector<2x32xf32> -> vector<2x256xf32>
    %c0_54 = arith.constant 0 : index
    %c0_55 = arith.constant 0 : index
    %115 = vector.load %arg16[%c0_54, %c0_55] : memref<2x256xf32, #tpu.memory_space<vmem>>, vector<2x256xf32>
    tpu.vector_store %arg16[%c0_54, %c0_55], %114 {strides = array<i32>} : memref<2x256xf32, #tpu.memory_space<vmem>>, vector<2x256xf32>,
    return
  }
  func.func @transform_0(%arg0: i32) -> (i32, i32) {
    %c0_i32 = arith.constant 0 : i32
    %c0_i32_0 = arith.constant 0 : i32
    return %arg0, %c0_i32 : i32, i32
  }
  func.func @transform_1(%arg0: i32) -> (i32, i32, i32) {
    %c0_i32 = arith.constant 0 : i32
    %c0_i32_0 = arith.constant 0 : i32
    %c0_i32_1 = arith.constant 0 : i32
    %c0_i32_2 = arith.constant 0 : i32
    return %c0_i32, %c0_i32_0, %c0_i32_1 : i32, i32, i32
  }
  func.func @transform_2(%arg0: i32) -> (i32, i32, i32) {
    %c0_i32 = arith.constant 0 : i32
    %c0_i32_0 = arith.constant 0 : i32
    %c0_i32_1 = arith.constant 0 : i32
    %c0_i32_2 = arith.constant 0 : i32
    return %c0_i32, %c0_i32_0, %c0_i32_1 : i32, i32, i32
  }
  func.func @transform_3(%arg0: i32) -> (i32, i32, i32) {
    %c0_i32 = arith.constant 0 : i32
    %c0_i32_0 = arith.constant 0 : i32
    %c0_i32_1 = arith.constant 0 : i32
    %c0_i32_2 = arith.constant 0 : i32
    return %c0_i32, %c0_i32_0, %c0_i32_1 : i32, i32, i32
  }
  func.func @transform_4(%arg0: i32) -> (i32, i32, i32) {
    %c0_i32 = arith.constant 0 : i32
    %c0_i32_0 = arith.constant 0 : i32
    %c0_i32_1 = arith.constant 0 : i32
    %c0_i32_2 = arith.constant 0 : i32
    return %c0_i32, %c0_i32_0, %c0_i32_1 : i32, i32, i32
  }
  func.func @transform_5(%arg0: i32) -> (i32, i32, i32) {
    %c0_i32 = arith.constant 0 : i32
    %c0_i32_0 = arith.constant 0 : i32
    %c0_i32_1 = arith.constant 0 : i32
    %c0_i32_2 = arith.constant 0 : i32
    return %c0_i32, %c0_i32_0, %c0_i32_1 : i32, i32, i32
  }
  func.func @transform_6(%arg0: i32) -> (i32, i32, i32) {
    %c0_i32 = arith.constant 0 : i32
    %c0_i32_0 = arith.constant 0 : i32
    %c0_i32_1 = arith.constant 0 : i32
    %c0_i32_2 = arith.constant 0 : i32
    return %c0_i32, %c0_i32_0, %c0_i32_1 : i32, i32, i32
  }
  func.func @transform_7(%arg0: i32) -> (i32, i32) {
    %c0_i32 = arith.constant 0 : i32
    %c0_i32_0 = arith.constant 0 : i32
    %c0_i32_1 = arith.constant 0 : i32
    return %c0_i32, %c0_i32_0 : i32, i32
  }
  func.func @transform_8(%arg0: i32) -> (i32, i32) {
    %c0_i32 = arith.constant 0 : i32
    %c0_i32_0 = arith.constant 0 : i32
    %c0_i32_1 = arith.constant 0 : i32
    return %c0_i32, %c0_i32_0 : i32, i32
  }
  func.func @transform_9(%arg0: i32) -> (i32, i32) {
    %c0_i32 = arith.constant 0 : i32
    %c0_i32_0 = arith.constant 0 : i32
    %c0_i32_1 = arith.constant 0 : i32
    return %c0_i32, %c0_i32_0 : i32, i32
  }
  func.func @transform_10(%arg0: i32) -> (i32, i32) {
    %c0_i32 = arith.constant 0 : i32
    %c0_i32_0 = arith.constant 0 : i32
    %c0_i32_1 = arith.constant 0 : i32
    return %c0_i32, %c0_i32_0 : i32, i32
  }
  func.func @transform_11(%arg0: i32) -> (i32, i32) {
    %c0_i32 = arith.constant 0 : i32
    %c0_i32_0 = arith.constant 0 : i32
    %c0_i32_1 = arith.constant 0 : i32
    return %c0_i32, %c0_i32_0 : i32, i32
  }
  func.func @transform_12(%arg0: i32) -> (i32, i32) {
    %c0_i32 = arith.constant 0 : i32
    %c0_i32_0 = arith.constant 0 : i32
    %c0_i32_1 = arith.constant 0 : i32
    return %c0_i32, %c0_i32_0 : i32, i32
  }
  func.func @transform_13(%arg0: i32) -> (i32, i32) {
    %c0_i32 = arith.constant 0 : i32
    %c0_i32_0 = arith.constant 0 : i32
    %c0_i32_1 = arith.constant 0 : i32
    return %c0_i32, %c0_i32_0 : i32, i32
  }
  func.func @transform_14(%arg0: i32) -> (i32, i32) {
    %c0_i32 = arith.constant 0 : i32
    %c0_i32_0 = arith.constant 0 : i32
    %c0_i32_1 = arith.constant 0 : i32
    return %c0_i32, %c0_i32_0 : i32, i32
  }
  func.func @transform_15(%arg0: i32) -> (i32, i32) {
    %c0_i32 = arith.constant 0 : i32
    %c0_i32_0 = arith.constant 0 : i32
    return %arg0, %c0_i32 : i32, i32
  }
}

</mosaic_0001>

<bundles_post_ra>
// kernel: tpu_custom_call.1
= control target key start
LH: loop header
LB: loop body
LE: loop exit
PB: predicated region body
PF: predicated region fallthrough
CT: control target
= control target key end

     0   :  { %v2579_v3 = vmov 0.0|0.0   ;;  %vm2580_vm0 = vmmov 0   ;;  %v2581_v11 = vmov 0.0   ;;  %vm97_vm1 = vcmask 261120   ;;  %s3100_s0 = inlined_call_operand.vmem [shape: f32[16,32], index: 0, kind: input, shape index: {}]   ;;  %s3101_s1 = inlined_call_operand.vmem [shape: f32[4,32,16], index: 1, kind: input, shape index: {}]   ;;  %s3102_s2 = inlined_call_operand.vmem [shape: f32[4,1,16], index: 2, kind: input, shape index: {}]   ;;  %s3103_s3 = inlined_call_operand.vmem [shape: f32[4,32,16], index: 3, kind: input, shape index: {}]   ;;  %s3104_s4 = inlined_call_operand.vmem [shape: f32[4,1,16], index: 4, kind: input, shape index: {}]   ;;  %s3105_s5 = inlined_call_operand.vmem [shape: f32[4,32,16], index: 5, kind: input, shape index: {}]   ;;  %s3106_s6 = inlined_call_operand.vmem [shape: f32[4,1,16], index: 6, kind: input, shape index: {}]   ;;  %s3107_s7 = inlined_call_operand.vmem [shape: f32[32,128], index: 7, kind: input, shape index: {}]   ;;  %s3108_s8 = inlined_call_operand.vmem [shape: f32[1,128], index: 8, kind: input, shape index: {}]   ;;  %s3109_s9 = inlined_call_operand.vmem [shape: f32[128,32], index: 9, kind: input, shape index: {}]   ;;  %s3110_s10 = inlined_call_operand.vmem [shape: f32[1,32], index: 10, kind: input, shape index: {}]   ;;  %s3111_s11 = inlined_call_operand.vmem [shape: f32[1,32], index: 11, kind: input, shape index: {}]   ;;  %s3112_s12 = inlined_call_operand.vmem [shape: f32[1,32], index: 12, kind: input, shape index: {}]   ;;  %s3113_s13 = inlined_call_operand.vmem [shape: f32[1,32], index: 13, kind: input, shape index: {}]   ;;  %s3114_s14 = inlined_call_operand.vmem [shape: f32[1,32], index: 14, kind: input, shape index: {}]   ;;  %s3115_s15 = inlined_call_operand.hbm [shape: f32[2,256], index: 15, kind: output, shape index: {}]  }
   0x1   :  { %v53_v0 = vld [vmem:[%s3101_s1] sm:$0xff]  ;;  %v54_v1 = vld [vmem:[%s3101_s1 + $0x8] sm:$0xff]  ;;  %2411 = vmatprep.subr.bf16.mxu0 %v2579_v3  ;;  %2429 = vmatprep.subr.bf16.mxu1 %v2579_v3  ;;  %v55_v6 = vld [vmem:[%s3101_s1 + $0x10] sm:$0xff] }
   0x2   :  { %v65_v2 = vld [vmem:[%s3101_s1 + $0x60] sm:$0xff]  ;;  %v2412_v4 = vpack.c.bf16 %v54_v1, %v53_v0  ;;  %v66_v5 = vld [vmem:[%s3101_s1 + $0x68] sm:$0xff]  ;;  %v56_v7 = vld [vmem:[%s3101_s1 + $0x18] sm:$0xff]  ;;  %2201 = vmatprep.mubr.msk.f32.mxu0 %vm2580_vm0, %v2581_v11  ;;  %2234 = vmatprep.mubr.msk.f32.mxu1 %vm2580_vm0, %v2581_v11 }
   0x3   :  { %v2430_v8 = vpack.c.bf16 %v66_v5, %v65_v2  ;;  %v67_v9 = vld [vmem:[%s3101_s1 + $0x70] sm:$0xff]  ;;  %v68_v10 = vld [vmem:[%s3101_s1 + $0x78] sm:$0xff]  ;;  %v2415_v12 = vpack.c.bf16 %v56_v7, %v55_v6  ;;  %v57_v14 = vld [vmem:[%s3101_s1 + $0x20] sm:$0xff] }
   0x4   :  { %2413 = vmatpush3.bf16.msra.mxu0 %v2412_v4  ;;  %v2433_v13 = vpack.c.bf16 %v68_v10, %v67_v9  ;;  %v58_v15 = vld [vmem:[%s3101_s1 + $0x28] sm:$0xff]  ;;  %v388_v16 = vld [vmem:[%s3103_s3 + $0x20] sm:$0xff]  ;;  %v59_v22 = vld [vmem:[%s3101_s1 + $0x30] sm:$0xff] }
   0x5   :  { %2431 = vmatpush3.bf16.msra.mxu1 %v2430_v8  ;;  %2414 = vmatprep.subr.bf16.mxu0 %v2579_v3  ;;  %v389_v17 = vld [vmem:[%s3103_s3 + $0x28] sm:$0xff]  ;;  %v2714_v18 = vld [vmem:[%s3100_s0] sm:$0xff]  ;;  %v2418_v19 = vpack.c.bf16 %v58_v15, %v57_v14  ;;  %v60_v23 = vld [vmem:[%s3101_s1 + $0x38] sm:$0xff] }
   0x6   :  { %2432 = vmatprep.subr.bf16.mxu1 %v2579_v3  ;;  %v2720_v20 = vld [vmem:[%s3100_s0 + $0x8] sm:$0xff]  ;;  %v2442_v21 = vpack.c.bf16 %v389_v17, %v388_v16  ;;  %v390_v24 = vld [vmem:[%s3103_s3 + $0x30] sm:$0xff]  ;;  %v391_v25 = vld [vmem:[%s3103_s3 + $0x38] sm:$0xff]  ;;  %v2421_v26 = vpack.c.bf16 %v60_v23, %v59_v22 }
   0x7   :  { %v2445_v27 = vpack.c.bf16 %v391_v25, %v390_v24  ;;  %v61_v28 = vld [vmem:[%s3101_s1 + $0x40] sm:$0xff]  ;;  %v62_v29 = vld [vmem:[%s3101_s1 + $0x48] sm:$0xff] }
   0x8   :  { %2416 = vmatpush3.bf16.msra.mxu0 %v2415_v12 }
   0x9   :  { %2434 = vmatpush3.bf16.msra.mxu1 %v2433_v13  ;;  %2417 = vmatprep.subr.bf16.mxu0 %v2579_v3 }
   0xa   :  { %2441 = vmatprep.subr.bf16.mxu1 %v2579_v3 }
   0xb   :  { %2202 = vmatmul.mubr.msk.f32.vlgmr.msra.gmra.mrb[0].mxu0 %vm97_vm1, %v2714_v18 }
   0xc   :  { %2419 = vmatpush3.bf16.msra.mxu0 %v2418_v19  ;;  %2235 = vmatmul.mubr.msk.f32.vlgmr.msra.gmra.mrb[0].mxu1 %vm97_vm1, %v2720_v20 }
   0xd   :  { %2443 = vmatpush3.bf16.msra.mxu1 %v2442_v21  ;;  %2420 = vmatprep.subr.bf16.mxu0 %v2579_v3 }
   0xe   :  { %20 = vsyncpa [#allocation3], 0  ;;  %2444 = vmatprep.subr.bf16.mxu1 %v2579_v3  ;;  %2212 = vmatprep.mubr.msk.f32.mxu0 %vm2580_vm0, %v2581_v11  ;;  %v396_v30 = vld [vmem:[%s3103_s3 + $0x60] sm:$0xff]  ;;  %v397_v31 = vld [vmem:[%s3103_s3 + $0x68] sm:$0xff]  ;;  %v2424_v32 = vpack.c.bf16 %v62_v29, %v61_v28  ;;  %vm1032_vm2 = vcmask 130048   ;;  %vm1337_vm3 = vcmask 64512  }
   0xf   :  { %2256 = vmatprep.mubr.msk.f32.mxu1 %vm2580_vm0, %v2581_v11  ;;  %v2454_v33 = vpack.c.bf16 %v397_v31, %v396_v30  ;;  %v63_v34 = vld [vmem:[%s3101_s1 + $0x50] sm:$0xff]  ;;  %v64_v35 = vld [vmem:[%s3101_s1 + $0x58] sm:$0xff]  ;;  %v384_v40 = vld [vmem:[%s3103_s3] sm:$0xff]  ;;  %vm1972_vm4 = vcmask 1041409   ;;  %s2585_s22 = smov 96   ;;  %vm2015_vm5 = vcmask 523264  }
  0x10   :  { %2422 = vmatpush3.bf16.msra.mxu0 %v2421_v26  ;;  %v398_v36 = vld [vmem:[%s3103_s3 + $0x70] sm:$0xff]  ;;  %v399_v37 = vld [vmem:[%s3103_s3 + $0x78] sm:$0xff]  ;;  %v2427_v38 = vpack.c.bf16 %v64_v35, %v63_v34  ;;  %v385_v41 = vld [vmem:[%s3103_s3 + $0x8] sm:$0xff]  ;;  %vm2017_vm6 = vcmask 785408   ;;  %s2586_s23 = smov [#allocation2]  }
  0x11   :  { %2446 = vmatpush3.bf16.msra.mxu1 %v2445_v27  ;;  %2423 = vmatprep.subr.bf16.mxu0 %v2579_v3  ;;  %v2457_v39 = vpack.c.bf16 %v399_v37, %v398_v36  ;;  %v712_v42 = vld [vmem:[%s3105_s5 + $0x20] sm:$0xff]  ;;  %v713_v43 = vld [vmem:[%s3105_s5 + $0x28] sm:$0xff]  ;;  %v2436_v44 = vpack.c.bf16 %v385_v41, %v384_v40  ;;  %v386_v45 = vld [vmem:[%s3103_s3 + $0x10] sm:$0xff]  ;;  %s2040_s1 = sshll.u32 %s2586_s23, 4  ;;  %s2041_s1 = int_to_ptr.vmem [resolvable:$true] %s2040_s1 }
  0x12   :  { %2453 = vmatprep.subr.bf16.mxu1 %v2579_v3  ;;  %v387_v46 = vld [vmem:[%s3103_s3 + $0x18] sm:$0xff]  ;;  %v2466_v47 = vpack.c.bf16 %v713_v43, %v712_v42  ;;  %v392_v49 = vld [vmem:[%s3103_s3 + $0x40] sm:$0xff]  ;;  %v393_v50 = vld [vmem:[%s3103_s3 + $0x48] sm:$0xff]  ;;  %s2555_s0 = scalar_lea.vmem %s2041_s1, 64  ;;  %p2560_p1 = scmp.lt.s32.totalorder %s2041_s1, %s2041_s1 }
  0x13   :  { %2213 = vmatmul.mubr.msk.f32.vlgmr.msra.gmra.mrb[2].mxu0 %vm97_vm1, %v2720_v20  ;;  %v2439_v48 = vpack.c.bf16 %v387_v46, %v386_v45  ;;  %v2448_v51 = vpack.c.bf16 %v393_v50, %v392_v49  ;;  %v394_v52 = vld [vmem:[%s3103_s3 + $0x50] sm:$0xff]  ;;  %v395_v53 = vld [vmem:[%s3103_s3 + $0x58] sm:$0xff]  ;;  %v708_v58 = vld [vmem:[%s3105_s5] sm:$0xff]  ;;  %p2556_p0 = scmp.ne.s32.totalorder %s2041_s1, %s2555_s0  ;;  %p2561_p2 = scmp.lt.s32.totalorder %s2555_s0, %s2555_s0 }
  0x14   :  { %2425 = vmatpush3.bf16.msra.mxu0 %v2424_v32  ;;  %2257 = vmatmul.mubr.msk.f32.vlgmr.msra.gmra.mrb[2].mxu1 %vm97_vm1, %v2720_v20  ;;  %v2451_v54 = vpack.c.bf16 %v395_v53, %v394_v52  ;;  %v714_v55 = vld [vmem:[%s3105_s5 + $0x30] sm:$0xff]  ;;  %v715_v56 = vld [vmem:[%s3105_s5 + $0x38] sm:$0xff]  ;;  %v709_v59 = vld [vmem:[%s3105_s5 + $0x8] sm:$0xff] }
  0x15   :  { %2455 = vmatpush3.bf16.msra.mxu1 %v2454_v33  ;;  %2426 = vmatprep.subr.bf16.mxu0 %v2579_v3  ;;  %v2469_v57 = vpack.c.bf16 %v715_v56, %v714_v55  ;;  %v720_v60 = vld [vmem:[%s3105_s5 + $0x60] sm:$0xff]  ;;  %v2460_v61 = vpack.c.bf16 %v709_v59, %v708_v58  ;;  %v721_v62 = vld [vmem:[%s3105_s5 + $0x68] sm:$0xff]  ;;  %v710_v0 = vld [vmem:[%s3105_s5 + $0x10] sm:$0xff]  ;;  %p2562_p3 = por %p2561_p2, %p2560_p1 }
  0x16   :  { %2456 = vmatprep.subr.bf16.mxu1 %v2579_v3  ;;  %2223 = vmatprep.mubr.msk.f32.mxu0 %vm2580_vm0, %v2581_v11  ;;  %v2478_v63 = vpack.c.bf16 %v721_v62, %v720_v60  ;;  %v711_v1 = vld [vmem:[%s3105_s5 + $0x18] sm:$0xff]  ;;  %v722_v4 = vld [vmem:[%s3105_s5 + $0x70] sm:$0xff]  ;;  %v716_v7 = vld [vmem:[%s3105_s5 + $0x40] sm:$0xff] }
  0x17   :  { %2278 = vmatprep.mubr.msk.f32.mxu1 %vm2580_vm0, %v2581_v11  ;;  %v2463_v2 = vpack.c.bf16 %v711_v1, %v710_v0  ;;  %v723_v5 = vld [vmem:[%s3105_s5 + $0x78] sm:$0xff]  ;;  %v717_v8 = vld [vmem:[%s3105_s5 + $0x48] sm:$0xff]  ;;  %v718_v10 = vld [vmem:[%s3105_s5 + $0x50] sm:$0xff]  ;;  %p2563_p4 = pnand %p2562_p3, %p2556_p0 }
  0x18   :  { %2428 = vmatpush3.bf16.msra.mxu0 %v2427_v38  ;;  %v2481_v6 = vpack.c.bf16 %v723_v5, %v722_v4  ;;  %v2472_v9 = vpack.c.bf16 %v717_v8, %v716_v7  ;;  %v719_v12 = vld [vmem:[%s3105_s5 + $0x58] sm:$0xff]  ;;  %v2059_v23 = vld [vmem:[%s3104_s4 + $0x3] ss:$0 sm:$0xff]  ;;  %v2056_v31 = vld [vmem:[%s3104_s4] ss:$0 sm:$0xff] }
  0x19   :  { %2458 = vmatpush3.bf16.msra.mxu1 %v2457_v39  ;;  %2435 = vmatprep.subr.bf16.mxu0 %v2579_v3  ;;  %v2475_v13 = vpack.c.bf16 %v719_v12, %v718_v10  ;;  %v2051_v24 = vld [vmem:[%s3102_s2 + $0x3] ss:$0 sm:$0xff]  ;;  %v2057_v32 = vld [vmem:[%s3104_s4 + $0x1] ss:$0 sm:$0xff]  ;;  %v2048_v34 = vld [vmem:[%s3102_s2] ss:$0 sm:$0xff] }
  0x1a   :  { %2465 = vmatprep.subr.bf16.mxu1 %v2579_v3  ;;  %v2049_v39 = vld [vmem:[%s3102_s2 + $0x1] ss:$0 sm:$0xff]  ;;  %v2058_v40 = vld [vmem:[%s3104_s4 + $0x2] ss:$0 sm:$0xff] }
  0x1b   :  { %2224 = vmatmul.mubr.msk.f32.vlgmr.msra.gmra.mrb[4].mxu0 %vm97_vm1, %v2714_v18  ;;  %v2050_v43 = vld [vmem:[%s3102_s2 + $0x2] ss:$0 sm:$0xff] }
  0x1c   :  { %2437 = vmatpush3.bf16.msra.mxu0 %v2436_v44  ;;  %2279 = vmatmul.mubr.msk.f32.vlgmr.msra.gmra.mrb[4].mxu1 %vm97_vm1, %v2720_v20 }
  0x1d   :  { %2438 = vmatprep.subr.bf16.mxu0 %v2579_v3  ;;  %2245 = vmatprep.mubr.msk.f32.mxu0 %vm2580_vm0, %v2581_v11 }
  0x1e   :  { %2467 = vmatpush3.bf16.msra.mxu1 %v2466_v47  ;;  %2300 = vmatprep.mubr.msk.f32.mxu1 %vm2580_vm0, %v2581_v11  ;;  %v2065_v47 = vld [vmem:[%s3106_s6 + $0x1] ss:$0 sm:$0xff] }
  0x1f   :  { %2468 = vmatprep.subr.bf16.mxu1 %v2579_v3 }
  0x20   :  { %2440 = vmatpush3.bf16.msra.mxu0 %v2439_v48 }
  0x21   :  { %2447 = vmatprep.subr.bf16.mxu0 %v2579_v3 }
  0x22   :  { %2470 = vmatpush3.bf16.msra.mxu1 %v2469_v57 }
  0x23   :  { %2246 = vmatmul.mubr.msk.f32.vlgmr.msra.gmra.mrb[6].mxu0 %vm97_vm1, %v2714_v18  ;;  %2477 = vmatprep.subr.bf16.mxu1 %v2579_v3 }
  0x24   :  { %2449 = vmatpush3.bf16.msra.mxu0 %v2448_v51  ;;  %2267 = vmatprep.mubr.msk.f32.mxu0 %vm2580_vm0, %v2581_v11  ;;  %v2064_v51 = vld [vmem:[%s3106_s6] ss:$0 sm:$0xff] }
  0x25   :  { %2450 = vmatprep.subr.bf16.mxu0 %v2579_v3  ;;  %2301 = vmatmul.mubr.msk.f32.vlgmr.msra.gmra.mrb[6].mxu1 %vm97_vm1, %v2720_v20 }
  0x26   :  { %2479 = vmatpush3.bf16.msra.mxu1 %v2478_v63  ;;  %2322 = vmatprep.mubr.msk.f32.mxu1 %vm2580_vm0, %v2581_v11 }
  0x27   :  { %2480 = vmatprep.subr.bf16.mxu1 %v2579_v3 }
  0x28   :  { %2452 = vmatpush3.bf16.msra.mxu0 %v2451_v54 }
  0x29   :  { %2459 = vmatprep.subr.bf16.mxu0 %v2579_v3 }
  0x2a   :  { %2482 = vmatpush3.bf16.msra.mxu1 %v2481_v6 }
  0x2b   :  { %2268 = vmatmul.mubr.msk.f32.vlgmr.msra.gmra.mrb[8].mxu0 %vm97_vm1, %v2714_v18  ;;  %2340 = vmatprep.subr.mxu1 %v2581_v11 }
  0x2c   :  { %2289 = vmatprep.mubr.msk.f32.mxu0 %vm2580_vm0, %v2581_v11  ;;  %2461 = vmatpush3.bf16.msra.mxu0 %v2460_v61 }
  0x2d   :  { %2462 = vmatprep.subr.bf16.mxu0 %v2579_v3  ;;  %2323 = vmatmul.mubr.msk.f32.vlgmr.msra.gmra.mrb[8].mxu1 %vm97_vm1, %v2720_v20 }
  0x2e   :  { %2342 = vmatprep.mubr.msk.f32.mxu1 %vm2580_vm0, %v2581_v11 }
  0x30   :  { %2464 = vmatpush3.bf16.msra.mxu0 %v2463_v2 }
  0x31   :  { %2471 = vmatprep.subr.bf16.mxu0 %v2579_v3 }
  0x33   :  { %2290 = vmatmul.mubr.msk.f32.vlgmr.msra.gmra.mrb[10].mxu0 %vm97_vm1, %v2714_v18 }
  0x34   :  { %2473 = vmatpush3.bf16.msra.mxu0 %v2472_v9  ;;  %2311 = vmatprep.mubr.msk.f32.mxu0 %vm2580_vm0, %v2581_v11 }
  0x35   :  { %2474 = vmatprep.subr.bf16.mxu0 %v2579_v3 }
  0x38   :  { %2476 = vmatpush3.bf16.msra.mxu0 %v2475_v13 }
  0x39   :  { %2325 = vmatprep.subr.mxu0 %v2581_v11 }
  0x3b   :  { %2312 = vmatmul.mubr.msk.f32.vlgmr.msra.gmra.mrb[12].mxu0 %vm97_vm1, %v2714_v18 }
  0x3c   :  { %2327 = vmatprep.mubr.msk.f32.mxu0 %vm2580_vm0, %v2581_v11 }
  0xde   :  { %v167_v3 = vpop.f32.mrb[0].mxu0 }
  0xdf   :  { %v2203_v14 = vpop.f32.mrb[1].mxu0  ;;  %v380_v15 = vpop.f32.mrb[0].mxu1  ;;  %v168_v38 = vadd.f32 %v2048_v34, %v167_v3 }
  0xe0   :  { %v2236_v16 = vpop.f32.mrb[1].mxu1  ;;  %v381_v30 = vadd.f32 %v2051_v24, %v380_v15 }
  0xe6   :  { %v240_v17 = vpop.f32.mrb[2].mxu0 }
  0xe7   :  { %v2214_v19 = vpop.f32.mrb[3].mxu0  ;;  %v564_v21 = vpop.f32.mrb[2].mxu1  ;;  %v241_v41 = vadd.f32 %v2049_v39, %v240_v17 }
  0xe8   :  { %v2258_v22 = vpop.f32.mrb[3].mxu1  ;;  %v565_v37 = vadd.f32 %v2057_v32, %v564_v21 }
  0xee   :  { %v310_v25 = vpop.f32.mrb[4].mxu0 }
  0xef   :  { %v2225_v26 = vpop.f32.mrb[5].mxu0  ;;  %v704_v27 = vpop.f32.mrb[4].mxu1  ;;  %v311_v46 = vadd.f32 %v2050_v43, %v310_v25 }
  0xf0   :  { %v705_v28 = vadd.f32 %v2059_v23, %v704_v27  ;;  %v2280_v29 = vpop.f32.mrb[5].mxu1 }
  0xf2   :  { %2341 = vmatpush3.xpose.msk.msra.mxu1 %vm1032_vm2, %v705_v28 }
  0xf3   :  { %2350 = vmatprep.subr.mxu1 %v2581_v11 }
  0xf5   :  { %2343 = vmatmul.mubr.msk.f32.vlgmr.msra.gmra.mrb[10].mxu1 %vm1032_vm2, %v381_v30 }
  0xf6   :  { %v494_v33 = vpop.f32.mrb[6].mxu0  ;;  %2352 = vmatprep.mubr.msk.f32.mxu1 %vm2580_vm0, %v2581_v11 }
  0xf7   :  { %v495_v35 = vadd.f32 %v2056_v31, %v494_v33  ;;  %v2247_v36 = vpop.f32.mrb[7].mxu0  ;;  %v2066_v33 = vld [vmem:[%s3106_s6 + $0x2] ss:$0 sm:$0xff] }
  0xf8   :  { %v888_v48 = vpop.f32.mrb[6].mxu1 }
  0xf9   :  { %2326 = vmatpush3.xpose.msk.msra.mxu0 %vm1032_vm2, %v495_v35  ;;  %v889_v49 = vadd.f32 %v2065_v47, %v888_v48  ;;  %v2302_v50 = vpop.f32.mrb[7].mxu1 }
  0xfa   :  { %2330 = vmatprep.subr.mxu0 %v2581_v11 }
  0xfb   :  { %2351 = vmatpush3.msra.mxu1 %v889_v49 }
  0xfc   :  { %2328 = vmatmul.mubr.msk.f32.vlgmr.msra.gmra.mrb[14].mxu0 %vm1032_vm2, %v168_v38  ;;  %2360 = vmatprep.subr.mxu1 %v2581_v11  ;;  %v2067_v38 = vld [vmem:[%s3106_s6 + $0x3] ss:$0 sm:$0xff]  ;;  %s2582_s6 = smov 16  }
  0xfd   :  { %2331 = vmatpush3.xpose.msk.msra.mxu0 %vm1032_vm2, %v565_v37  ;;  %2332 = vmatprep.mubr.msk.f32.mxu0 %vm2580_vm0, %v2581_v11 }
  0xfe   :  { %v634_v42 = vpop.f32.mrb[8].mxu0  ;;  %2335 = vmatprep.subr.mxu0 %v2581_v11 }
  0xff   :  { %v635_v44 = vadd.f32 %v2058_v40, %v634_v42  ;;  %v2269_v45 = vpop.f32.mrb[9].mxu0 }
 0x100   :  { %2333 = vmatmul.mubr.msk.f32.vlgmr.msra.gmra.mrb[16].mxu0 %vm1032_vm2, %v241_v41  ;;  %v2950_v55 = vpop.f32.mrb[8].mxu1 }
 0x101   :  { %2336 = vmatpush3.xpose.msk.msra.mxu0 %vm1032_vm2, %v635_v44  ;;  %2337 = vmatprep.mubr.msk.f32.mxu0 %vm2580_vm0, %v2581_v11  ;;  %v2324_v56 = vpop.f32.mrb[9].mxu1  ;;  %v1029_v41 = vadd.f32 %v2067_v38, %v2950_v55 }
 0x102   :  { %2345 = vmatprep.subr.mxu0 %v2581_v11 }
 0x104   :  { %2338 = vmatmul.mubr.msk.f32.vlgmr.msra.gmra.mrb[18].mxu0 %vm1032_vm2, %v311_v46 }
 0x105   :  { %2347 = vmatprep.mubr.msk.f32.mxu0 %vm2580_vm0, %v2581_v11 }
 0x106   :  { %v818_v52 = vpop.f32.mrb[10].mxu0 }
 0x107   :  { %v819_v53 = vadd.f32 %v2064_v51, %v818_v52  ;;  %v2291_v54 = vpop.f32.mrb[11].mxu0 }
 0x109   :  { %2346 = vmatpush3.msra.mxu0 %v819_v53 }
 0x10a   :  { %2355 = vmatprep.subr.mxu0 %v2581_v11 }
 0x10e   :  { %v958_v57 = vpop.f32.mrb[12].mxu0 }
 0x10f   :  { %v2313_v58 = vpop.f32.mrb[13].mxu0  ;;  %v959_v37 = vadd.f32 %v2066_v33, %v958_v57  ;;  %v1838_v33 = vld [vmem:[%s3109_s9 + $0x68] sm:$0xff] }
 0x1c8   :  { %v1333_v59 = vpop.f32.mrb[10].mxu1 }
 0x1c9   :  { %v2344_v60 = vpop.f32.mrb[11].mxu1  ;;  %v1347_v7 = vsel %vm1337_vm3, %v1333_v59, -inf }
 0x1cf   :  { %v1105_v61 = vpop.f32.mrb[14].mxu0 }
 0x1d0   :  { %v2329_v62 = vpop.f32.mrb[15].mxu0  ;;  %v1338_v63 = vsel %vm1337_vm3, %v1105_v61, -inf }
 0x1d1   :  { %1339 = vmax.xlane.f32.xlu0 %v1338_v63 }
 0x1d3   :  { %v1181_v0 = vpop.f32.mrb[16].mxu0 }
 0x1d4   :  { %v2334_v1 = vpop.f32.mrb[17].mxu0  ;;  %v1341_v2 = vsel %vm1337_vm3, %v1181_v0, -inf }
 0x1d5   :  { %1342 = vmax.xlane.f32.xlu0 %v1341_v2 }
 0x1d7   :  { %v1257_v4 = vpop.f32.mrb[18].mxu0 }
 0x1d8   :  { %v2339_v5 = vpop.f32.mrb[19].mxu0  ;;  %v1344_v6 = vsel %vm1337_vm3, %v1257_v4, -inf }
 0x1d9   :  { %1345 = vmax.xlane.f32.xlu1 %v1344_v6  ;;  %v1731_v6 = vld [vmem:[%s3107_s7] sm:$0xff] }
 0x1dd   :  { %1348 = vmax.xlane.f32.xlu1 %v1347_v7  ;;  %v1732_v7 = vld [vmem:[%s3107_s7 + $0x8] sm:$0xff] }
 0x25e   :  { %v1340_v8 = vpop.xlane.xlu0 %1339 }
 0x25f   :  { %v1350_v9 = vsub.f32 %v1105_v61, %v1340_v8  ;;  %v2483_v8 = vpack.c.bf16 %v1732_v7, %v1731_v6 }
 0x261   :  { %v1354_v10 = vmul.f32 1.442695, %v1350_v9  ;;  %v1733_v9 = vld [vmem:[%s3107_s7 + $0x10] sm:$0xff] }
 0x262   :  { %v1343_v12 = vpop.xlane.xlu0 %1342 }
 0x263   :  { %2531 = vpow2.f32 %v1354_v10  ;;  %v1351_v13 = vsub.f32 %v1181_v0, %v1343_v12  ;;  %v1734_v10 = vld [vmem:[%s3107_s7 + $0x18] sm:$0xff] }
 0x264   :  { %v2487_v12 = vpack.c.bf16 %v1734_v10, %v1733_v9 }
 0x265   :  { %v1356_v3 = vmul.f32 1.442695, %v1351_v13  ;;  %v1825_v13 = vld [vmem:[%s3109_s9] sm:$0xff] }
 0x266   :  { %v1346_v14 = vpop.xlane.xlu1 %1345 }
 0x267   :  { %2533 = vpow2.f32 %v1356_v3  ;;  %v1352_v15 = vsub.f32 %v1257_v4, %v1346_v14  ;;  %v1826_v3 = vld [vmem:[%s3109_s9 + $0x8] sm:$0xff]  ;;  %v1827_v14 = vld [vmem:[%s3109_s9 + $0x10] sm:$0xff] }
 0x269   :  { %v1358_v16 = vmul.f32 1.442695, %v1352_v15  ;;  %v2491_v15 = vpack.c.bf16 %v1826_v3, %v1825_v13 }
 0x26a   :  { %v1349_v17 = vpop.xlane.xlu1 %1348 }
 0x26b   :  { %2535 = vpow2.f32 %v1358_v16  ;;  %v1353_v19 = vsub.f32 %v1333_v59, %v1349_v17  ;;  %v1828_v16 = vld [vmem:[%s3109_s9 + $0x18] sm:$0xff] }
 0x26c   :  { %v2495_v17 = vpack.c.bf16 %v1828_v16, %v1827_v14 }
 0x26d   :  { %v2532_v21 = vpop.eup %2531  ;;  %v1360_v22 = vmul.f32 1.442695, %v1353_v19  ;;  %v1829_v19 = vld [vmem:[%s3109_s9 + $0x20] sm:$0xff] }
 0x26e   :  { %v1362_v23 = vsel %vm1337_vm3, %v2532_v21, 0.0 }
 0x26f   :  { %2537 = vpow2.f32 %v1360_v22  ;;  %1363 = vadd.xlane.f32.xlu0 %v1362_v23  ;;  %v1831_v23 = vld [vmem:[%s3109_s9 + $0x30] sm:$0xff] }
 0x271   :  { %v2534_v24 = vpop.eup %2533 }
 0x272   :  { %v1365_v25 = vsel %vm1337_vm3, %v2534_v24, 0.0 }
 0x273   :  { %1366 = vadd.xlane.f32.xlu1 %v1365_v25 }
 0x275   :  { %v2536_v26 = vpop.eup %2535 }
 0x276   :  { %v1368_v27 = vsel %vm1337_vm3, %v2536_v26, 0.0 }
 0x277   :  { %1369 = vadd.xlane.f32.xlu0 %v1368_v27  ;;  %v1834_v27 = vld [vmem:[%s3109_s9 + $0x48] sm:$0xff] }
 0x279   :  { %v2538_v28 = vpop.eup %2537 }
 0x27a   :  { %v1371_v29 = vsel %vm1337_vm3, %v2538_v28, 0.0 }
 0x27b   :  { %1372 = vadd.xlane.f32.xlu1 %v1371_v29  ;;  %v1835_v29 = vld [vmem:[%s3109_s9 + $0x50] sm:$0xff] }
 0x2fc   :  { %v1364_v30 = vpop.xlane.xlu0 %1363 }
 0x2fd   :  { %2539 = vrcp.f32 %v1364_v30  ;;  %v1836_v30 = vld [vmem:[%s3109_s9 + $0x58] sm:$0xff] }
 0x300   :  { %v1367_v31 = vpop.xlane.xlu1 %1366 }
 0x301   :  { %2541 = vrcp.f32 %v1367_v31  ;;  %v2511_v31 = vpack.c.bf16 %v1836_v30, %v1835_v29 }
 0x304   :  { %v1370_v32 = vpop.xlane.xlu0 %1369 }
 0x305   :  { %2543 = vrcp.f32 %v1370_v32  ;;  %v1837_v32 = vld [vmem:[%s3109_s9 + $0x60] sm:$0xff] }
 0x307   :  { %v2540_v34 = vpop.eup %2539 }
 0x308   :  { %v1378_v35 = vmul.f32 %v2540_v34, %v2532_v21  ;;  %v1373_v36 = vpop.xlane.xlu1 %1372  ;;  %v1830_v21 = vld [vmem:[%s3109_s9 + $0x28] sm:$0xff]  ;;  %v2515_v34 = vpack.c.bf16 %v1838_v33, %v1837_v32 }
 0x309   :  { %2545 = vrcp.f32 %v1373_v36  ;;  %v2499_v22 = vpack.c.bf16 %v1830_v21, %v1829_v19 }
 0x30a   :  { %2348 = vmatmul.mubr.msk.f32.vlgmr.msra.gmra.mrb[20].mxu0 %vm1337_vm3, %v1378_v35 }
 0x30b   :  { %v2542_v39 = vpop.eup %2541  ;;  %2356 = vmatpush3.msra.mxu0 %v959_v37  ;;  %2357 = vmatprep.mubr.msk.f32.mxu0 %vm2580_vm0, %v2581_v11 }
 0x30c   :  { %v1379_v40 = vmul.f32 %v2542_v39, %v2534_v24  ;;  %2484 = vmatprep.subr.bf16.mxu0 %v2483_v8  ;;  %v1832_v24 = vld [vmem:[%s3109_s9 + $0x38] sm:$0xff] }
 0x30d   :  { %v2503_v25 = vpack.c.bf16 %v1832_v24, %v1831_v23  ;;  %v2090_v23 = vld [vmem:[%s3113_s13] ss:$0 sm:$0xff]  ;;  %s2583_s13 = smov 32  }
 0x30e   :  { %2353 = vmatmul.mubr.msk.f32.vlgmr.msra.gmra.mrb[12].mxu1 %vm1337_vm3, %v1379_v40 }
 0x30f   :  { %v2544_v42 = vpop.eup %2543  ;;  %2361 = vmatpush3.msra.mxu1 %v1029_v41  ;;  %2362 = vmatprep.mubr.msk.f32.mxu1 %vm2580_vm0, %v2581_v11 }
 0x310   :  { %v1380_v43 = vmul.f32 %v2544_v42, %v2536_v26  ;;  %2492 = vmatprep.subr.bf16.mxu1 %v2491_v15  ;;  %v1833_v26 = vld [vmem:[%s3109_s9 + $0x40] sm:$0xff] }
 0x311   :  { %v2084_v42 = vld [vmem:[%s3111_s11] ss:$0 sm:$0xff] }
 0x312   :  { %2358 = vmatmul.mubr.msk.f32.vlgmr.msra.gmra.mrb[22].mxu0 %vm1337_vm3, %v1380_v43 }
 0x313   :  { %v2546_v44 = vpop.eup %2545  ;;  %2486 = vmatpush3.bf16.msra.mxu0 %v2483_v8 }
 0x314   :  { %v1381_v45 = vmul.f32 %v2546_v44, %v2538_v28  ;;  %2488 = vmatprep.subr.bf16.mxu0 %v2487_v12  ;;  %v2507_v28 = vpack.c.bf16 %v1834_v27, %v1833_v26  ;;  %v2085_v44 = vld [vmem:[%s3112_s12] ss:$0 sm:$0xff] }
 0x315   :  { %v2091_v26 = vld [vmem:[%s3114_s14] ss:$0 sm:$0xff]  ;;  %s2584_s14 = smov 64  }
 0x316   :  { %2363 = vmatmul.mubr.msk.f32.vlgmr.msra.gmra.mrb[14].mxu1 %vm1337_vm3, %v1381_v45 }
 0x317   :  { %2490 = vmatpush3.bf16.msra.mxu0 %v2487_v12  ;;  %2494 = vmatpush3.bf16.msra.mxu1 %v2491_v15 }
 0x318   :  { %2496 = vmatprep.subr.bf16.mxu1 %v2495_v17 }
 0x31b   :  { %2498 = vmatpush3.bf16.msra.mxu1 %v2495_v17 }
 0x31c   :  { %2500 = vmatprep.subr.bf16.mxu1 %v2499_v22 }
 0x31f   :  { %2502 = vmatpush3.bf16.msra.mxu1 %v2499_v22 }
 0x320   :  { %2504 = vmatprep.subr.bf16.mxu1 %v2503_v25 }
 0x323   :  { %2506 = vmatpush3.bf16.msra.mxu1 %v2503_v25 }
 0x324   :  { %2508 = vmatprep.subr.bf16.mxu1 %v2507_v28 }
 0x327   :  { %2510 = vmatpush3.bf16.msra.mxu1 %v2507_v28 }
 0x328   :  { %2512 = vmatprep.subr.bf16.mxu1 %v2511_v31 }
 0x32b   :  { %2514 = vmatpush3.bf16.msra.mxu1 %v2511_v31 }
 0x32c   :  { %2516 = vmatprep.subr.bf16.mxu1 %v2515_v34 }
 0x32f   :  { %2518 = vmatpush3.bf16.msra.mxu1 %v2515_v34 }
 0x3dd   :  { %v1451_v46 = vpop.f32.mrb[20].mxu0 }
 0x3de   :  { %v2349_v47 = vpop.f32.mrb[21].mxu0 }
 0x3e1   :  { %v1524_v48 = vpop.f32.mrb[12].mxu1 }
 0x3e2   :  { %v2354_v49 = vpop.f32.mrb[13].mxu1 }
 0x3e5   :  { %v1597_v50 = vpop.f32.mrb[22].mxu0 }
 0x3e6   :  { %1676 = vrot.lane.b32.xlu0 %v1597_v50, %s2582_s6  ;;  %v2359_v51 = vpop.f32.mrb[23].mxu0 }
 0x3e7   :  { %v1839_v51 = vld [vmem:[%s3109_s9 + $0x70] sm:$0xff] }
 0x3e9   :  { %v1670_v52 = vpop.f32.mrb[14].mxu1 }
 0x3ea   :  { %1678 = vrot.lane.b32.xlu1 %v1670_v52, %s2582_s6  ;;  %v2364_v53 = vpop.f32.mrb[15].mxu1  ;;  %v1840_v52 = vld [vmem:[%s3109_s9 + $0x78] sm:$0xff] }
 0x3eb   :  { %v2519_v53 = vpack.c.bf16 %v1840_v52, %v1839_v51 }
 0x3ed   :  { %2520 = vmatprep.subr.bf16.mxu1 %v2519_v53 }
 0x3ee   :  { %2522 = vmatpush3.bf16.msra.mxu1 %v2519_v53 }
 0x458   :  { %v1677_v54 = vpop.permute.xlu0 %1676 }
 0x459   :  { %v1682_v11 = vsel %vm1032_vm2, %v1451_v46, %v1677_v54  ;;  %v2086_v54 = vld [vmem:[%s3108_s8] ss:$0 sm:$0xff] }
 0x45a   :  { %v1684_v55 = vadd.f32 %v1682_v11, %v2714_v18 }
 0x45c   :  { %v1679_v56 = vpop.permute.xlu1 %1678  ;;  %v1688_v57 = vsel %vm97_vm1, %v1684_v55, 0.0 }
 0x45d   :  { %v1683_v58 = vsel %vm1032_vm2, %v1524_v48, %v1679_v56  ;;  %1689 = vadd.xlane.f32.xlu1 %v1688_v57 }
 0x45e   :  { %v1685_v59 = vadd.f32 %v1683_v58, %v2720_v20 }
 0x460   :  { %v1691_v60 = vsel %vm97_vm1, %v1685_v59, 0.0 }
 0x461   :  { %1692 = vadd.xlane.f32.xlu0 %v1691_v60  ;;  %v2089_v60 = vld [vmem:[%s3110_s10] ss:$0 sm:$0xff] }
 0x4ea   :  { %v1690_v61 = vpop.xlane.xlu1 %1689 }
 0x4eb   :  { %v1695_v62 = vmul.f32 0.03125, %v1690_v61 }
 0x4ed   :  { %v2982_v63 = vsub.f32 %v1684_v55, %v1695_v62 }
 0x4ee   :  { %v1693_v0 = vpop.xlane.xlu0 %1692 }
 0x4ef   :  { %v1696_v1 = vmul.f32 0.03125, %v1693_v0  ;;  %v1699_v18 = vmul.f32 %v2982_v63, %v2982_v63 }
 0x4f1   :  { %v2986_v2 = vsub.f32 %v1685_v59, %v1696_v1  ;;  %v1701_v4 = vsel %vm97_vm1, %v1699_v18, 0.0 }
 0x4f2   :  { %1702 = vadd.xlane.f32.xlu0 %v1701_v4 }
 0x4f3   :  { %v1700_v20 = vmul.f32 %v2986_v2, %v2986_v2 }
 0x4f5   :  { %v1704_v5 = vsel %vm97_vm1, %v1700_v20, 0.0 }
 0x4f6   :  { %1705 = vadd.xlane.f32.xlu1 %v1704_v5 }
 0x57f   :  { %v1703_v35 = vpop.xlane.xlu0 %1702 }
 0x580   :  { %v1707_v36 = vmul.f32 0.03125, %v1703_v35 }
 0x582   :  { %v1709_v37 = vadd.f32 1e-05, %v1707_v36 }
 0x583   :  { %v1706_v38 = vpop.xlane.xlu1 %1705 }
 0x584   :  { %2547 = vrsqrt.f32 %v1709_v37  ;;  %v1708_v39 = vmul.f32 0.03125, %v1706_v38 }
 0x586   :  { %v1710_v40 = vadd.f32 1e-05, %v1708_v39 }
 0x588   :  { %2549 = vrsqrt.f32 %v1710_v40 }
 0x58e   :  { %v2548_v41 = vpop.eup %2547 }
 0x58f   :  { %v1713_v43 = vmul.f32 %v2548_v41, %v2982_v63 }
 0x591   :  { %v1721_v45 = vmul.f32 %v2084_v42, %v1713_v43 }
 0x592   :  { %v2550_v46 = vpop.eup %2549 }
 0x593   :  { %v1714_v47 = vmul.f32 %v2550_v46, %v2986_v2  ;;  %v1729_v48 = vadd.f32 %v2085_v44, %v1721_v45 }
 0x595   :  { %v1722_v49 = vmul.f32 %v2084_v42, %v1714_v47  ;;  %2373 = vmatprep.mubr.msk.f32.mxu0 %vm97_vm1, %v1729_v48 }
 0x597   :  { %v1730_v50 = vadd.f32 %v2085_v44, %v1722_v49 }
 0x599   :  { %2374 = vmatmul.mubr.msk.f32.vlgmr.msra.gmra.mrb[24].mxu0 %vm97_vm1, %v1730_v50 }
 0x66c   :  { %v2375_v11 = vpop.f32.mrb[24].mxu0 }
 0x66d   :  { %v1820_v55 = vadd.f32 %v2375_v11, %v2086_v54  ;;  %v1814_v56 = vpop.f32.mrb[25].mxu0 }
 0x66e   :  { %v1815_v57 = vadd.f32 %v2086_v54, %v1814_v56 }
 0x66f   :  { %v1824_v59 = vmax.f32 %v1820_v55, 0.0 }
 0x670   :  { %v1823_v58 = vmax.f32 %v1815_v57, 0.0 }
 0x672   :  { %2408 = vmatprep.mubr.f32.mxu1 %v1823_v58 }
 0x673   :  { %2409 = vmatmul.mubr.f32.vlgmr.msra.gmra.mrb[16].mxu1 %v1824_v59 }
 0x746   :  { %v2410_v61 = vpop.f32.mrb[16].mxu1 }
 0x747   :  { %v1920_v62 = vadd.f32 %v2410_v61, %v2089_v60  ;;  %v1914_v63 = vpop.f32.mrb[17].mxu1 }
 0x748   :  { %v1915_v0 = vadd.f32 %v2089_v60, %v1914_v63 }
 0x749   :  { %v1924_v1 = vadd.f32 %v1920_v62, %v1730_v50 }
 0x74a   :  { %v1923_v18 = vadd.f32 %v1915_v0, %v1729_v48 }
 0x74b   :  { %v1930_v2 = vsel %vm97_vm1, %v1924_v1, 0.0 }
 0x74c   :  { %1931 = vadd.xlane.f32.xlu1 %v1930_v2  ;;  %v1927_v4 = vsel %vm97_vm1, %v1923_v18, 0.0 }
 0x74d   :  { %1928 = vadd.xlane.f32.xlu0 %v1927_v4 }
 0x7d9   :  { %v1932_v20 = vpop.xlane.xlu1 %1931 }
 0x7da   :  { %v1934_v5 = vmul.f32 0.03125, %v1932_v20  ;;  %v1929_v6 = vpop.xlane.xlu0 %1928 }
 0x7db   :  { %v1933_v7 = vmul.f32 0.03125, %v1929_v6 }
 0x7dc   :  { %v1936_v8 = vsub.f32 %v1924_v1, %v1934_v5 }
 0x7dd   :  { %v1935_v9 = vsub.f32 %v1923_v18, %v1933_v7 }
 0x7de   :  { %v1938_v10 = vmul.f32 %v1936_v8, %v1936_v8 }
 0x7df   :  { %v1937_v12 = vmul.f32 %v1935_v9, %v1935_v9 }
 0x7e0   :  { %v1942_v13 = vsel %vm97_vm1, %v1938_v10, 0.0 }
 0x7e1   :  { %1943 = vadd.xlane.f32.xlu1 %v1942_v13  ;;  %v1939_v3 = vsel %vm97_vm1, %v1937_v12, 0.0 }
 0x7e2   :  { %1940 = vadd.xlane.f32.xlu0 %v1939_v3 }
 0x86e   :  { %v1944_v14 = vpop.xlane.xlu1 %1943 }
 0x86f   :  { %v1946_v15 = vmul.f32 0.03125, %v1944_v14  ;;  %v1941_v16 = vpop.xlane.xlu0 %1940 }
 0x870   :  { %v1945_v17 = vmul.f32 0.03125, %v1941_v16 }
 0x871   :  { %v1948_v19 = vadd.f32 1e-05, %v1946_v15 }
 0x872   :  { %v1947_v21 = vadd.f32 1e-05, %v1945_v17 }
 0x873   :  { %2551 = vrsqrt.f32 %v1948_v19 }
 0x874   :  { %2553 = vrsqrt.f32 %v1947_v21 }
 0x87d   :  { %v2552_v22 = vpop.eup %2551 }
 0x87e   :  { %v2554_v24 = vpop.eup %2553  ;;  %v1952_v25 = vmul.f32 %v2552_v22, %v1936_v8 }
 0x87f   :  { %v1951_v27 = vmul.f32 %v2554_v24, %v1935_v9 }
 0x880   :  { %v1960_v28 = vmul.f32 %v2090_v23, %v1952_v25 }
 0x881   :  { %v1959_v29 = vmul.f32 %v2090_v23, %v1951_v27 }
 0x882   :  { %v1968_v30 = vadd.f32 %v2091_v26, %v1960_v28 }
 0x883   :  { %v1967_v31 = vadd.f32 %v2091_v26, %v1959_v29 }
 0x884   :  { %v1997_v32 = vrot.slane %v1968_v30, 4  ;;  %v1981_v35 = vrot.slane %v1968_v30, 1  ;;  %v1987_v36 = vrot.slane %v1968_v30, 2  ;;  %v1993_v37 = vrot.slane %v1968_v30, 3 }
 0x885   :  { %v1996_v33 = vrot.slane %v1967_v31, 5  ;;  %v1975_v34 = vrot.slane %v1967_v31, 1  ;;  %v1980_v40 = vrot.slane %v1967_v31, 2  ;;  %v1986_v41 = vrot.slane %v1967_v31, 3 }
 0x886   :  { %v1992_v42 = vrot.slane %v1967_v31, 4  ;;  %v1971_v43 = vrot.slane %v1968_v30, 7  ;;  %v2002_v48 = vrot.slane %v1967_v31, 6  ;;  %v2003_v49 = vrot.slane %v1968_v30, 5 }
 0x887   :  { %v1998_v38 = vsel %vm1972_vm4, %v1997_v32, %v1996_v33  ;;  %v1976_v39 = vsel %vm1972_vm4, %v1968_v30, %v1975_v34  ;;  %v1982_v46 = vsel %vm1972_vm4, %v1981_v35, %v1980_v40  ;;  %v1988_v47 = vsel %vm1972_vm4, %v1987_v36, %v1986_v41 }
 0x888   :  { %1999 = vrot.lane.b32.xlu1 %v1998_v38, %s2583_s13  ;;  %1977 = vrot.lane.b32.xlu0 %v1976_v39, %s2583_s13  ;;  %v1994_v44 = vsel %vm1972_vm4, %v1993_v37, %v1992_v42  ;;  %v1973_v45 = vsel %vm1972_vm4, %v1971_v43, %v1967_v31  ;;  %v2004_v50 = vsel %vm1972_vm4, %v2003_v49, %v2002_v48  ;;  %v2008_v51 = vrot.slane %v1967_v31, 7 }
 0x889   :  { %v2009_v52 = vrot.slane %v1968_v30, 6 }
 0x88b   :  { %v2010_v53 = vsel %vm1972_vm4, %v2009_v52, %v2008_v51 }
 0x88c   :  { %1983 = vrot.lane.b32.xlu1 %v1982_v46, %s2584_s14  ;;  %1989 = vrot.lane.b32.xlu0 %v1988_v47, %s2585_s22 }
 0x890   :  { %2005 = vrot.lane.b32.xlu1 %v2004_v50, %s2584_s14 }
 0x894   :  { %2011 = vrot.lane.b32.xlu1 %v2010_v53, %s2585_s22 }
 0x8fa   :  { %v2000_v54 = vpop.permute.xlu1 %1999  ;;  %v1978_v11 = vpop.permute.xlu0 %1977 }
 0x8fb   :  { %v2014_v57 = vsel %vm97_vm1, %v1973_v45, %v1978_v11  ;;  %v2019_v60 = vsel %vm97_vm1, %v1994_v44, %v2000_v54 }
 0x8fe   :  { %v1984_v55 = vpop.permute.xlu1 %1983  ;;  %v1990_v59 = vpop.permute.xlu0 %1989 }
 0x8ff   :  { %v2016_v58 = vsel %vm2015_vm5, %v2014_v57, %v1984_v55 }
 0x900   :  { %v2018_v63 = vsel %vm2017_vm6, %v2016_v58, %v1990_v59 }
 0x902   :  { %v2006_v56 = vpop.permute.xlu1 %2005 }
 0x903   :  { %v2020_v61 = vsel %vm2015_vm5, %v2019_v60, %v2006_v56 }
 0x906   :  { %v2012_v62 = vpop.permute.xlu1 %2011 }
 0x907   :  { %v2021_v0 = vsel %vm2017_vm6, %v2020_v61, %v2012_v62 }
 0x908   :  { %v2024_v1 = vcombine.low %v2018_v63, %v2021_v0 }
 0x90a   :  { %2092 = vst.sshfl [vmem:[#allocation2] sm:$0x33 pattern:$0x76325410] %v2024_v1 }
 0x90b   :  { %2566 = shalt.err (!%p2563_p4)
}
 0x90c   :  { %s2567_s25 = scalar_lea.hbm %s3115_s15, 64 }
 0x90d   :  { %p2568_p5 = scmp.ne.s32.totalorder %s3115_s15, %s2567_s25  ;;  %p2571_p6 = scmp.lt.u32.totalorder %s2567_s25, %s3115_s15 }
 0x90f   :  { %p2573_p7 = pnand %p2571_p6, %p2568_p5 }
 0x911   :  { %2576 = shalt.err (!%p2573_p7)
}
 0x912   :  { %2043 = dma.vmem_to_hbm [thread:$0]  %s2041_s1, 64, %s3115_s15, [#allocation3]  }
 0x913   :  { %2577 = dma.done.wait [#allocation3], 64  }
 0x914   :  { %2578 = vsyncadd [#allocation3], 4294967232 }
 0x915   :  { %2047 = vsyncpa [#allocation3], 1 }

</bundles_post_ra>
